<compile_context>
chip_gen: v5e
topology: v5e:2x2
jax: 0.10.0
libtpu: 0.0.40
codegen_flags: <defaults>
</compile_context>

<pallas_src>
import functools

import jax
import jax.numpy as jnp
from jax import lax
from jax.experimental import pallas as pl
from jax.experimental.pallas import tpu as pltpu


def _fold_rows(v, acc_rows):
    """(B, 1, T, 128) -> (acc_rows, 128) using only vreg-wise (VPU) adds."""
    r = jnp.sum(v, axis=(0, 1))                      # (T, 128)
    if r.shape[0] != acc_rows:
        r = jnp.sum(r.reshape(-1, acc_rows, 128), axis=0)
    return r


def _wbce_kernel(x_ref, y_ref, out_ref, *, hw, tile_rows, tiles_per_split,
                 acc_rows, needs_mask):
    """One (split, class, row-tile) step of the weighted-BCE reduction.

    x_ref, y_ref: (B, 1, tile_rows, 128) logits / targets for one class tile.
    out_ref:      (1, 1, 3, acc_rows, 128) resident partial accumulators:
                  [zero_count, S_zero, S_total].
    """
    t = pl.program_id(2)

    @pl.when(t == 0)
    def _init():
        out_ref[...] = jnp.zeros_like(out_ref)

    x = x_ref[...].astype(jnp.float32)
    y = y_ref[...].astype(jnp.float32)

    if needs_mask:
        s = pl.program_id(0)
        tile_idx = s * tiles_per_split + t           # un-clamped logical tile
        row = lax.broadcasted_iota(jnp.int32, (tile_rows, 128), 0)
        lane = lax.broadcasted_iota(jnp.int32, (tile_rows, 128), 1)
        flat = (tile_idx * tile_rows + row) * 128 + lane
        valid = flat < hw                            # (T, 128) bool
        valid_f = valid.astype(jnp.float32)
        x = jnp.where(valid, x, 0.0)                 # sanitize padded/OOB data
        y = jnp.where(valid, y, 1.0)                 # padded elems are "nonzero"
    else:
        valid_f = None

    zero = (y == 0.0).astype(jnp.float32)
    # numerically-stable BCE-with-logits (matches torch's elementwise formula)
    loss = jnp.maximum(x, 0.0) - x * y + jnp.log1p(jnp.exp(-jnp.abs(x)))
    if needs_mask:
        loss = loss * valid_f                        # zero padded contributions

    upd = jnp.stack([_fold_rows(zero, acc_rows),
                     _fold_rows(loss * zero, acc_rows),
                     _fold_rows(loss, acc_rows)])[None, None]
    out_ref[...] += upd


def weighted_multiclass_bce(logits, targets, *, vmem_limit_bytes=None,
                            max_rows_override=None, force_split=None):
    """Pallas equivalent of WeightedMultiClassBinaryCrossEntropy.forward.

    logits:  (B, C, H, W) logits (any float dtype; widened in-kernel).
    targets: (B, C, H, W) labels, or (B, H, W) which gets a channel dim added.
    Returns {'loss_contour_bce': scalar}.
    """
    if targets.ndim < 4:
        targets = targets[:, None, ...]
    if logits.ndim < 4:
        logits = logits[:, None, ...]
    B, C, H, W = targets.shape
    HW = H * W
    n_per_class = B * HW

    # ---- lane-dense layout: free reshape; pad HW up to a multiple of 128 ----
    pad = (-HW) % 128
    if pad:
        xf = jnp.pad(logits.reshape(B, C, HW), ((0, 0), (0, 0), (0, pad)))
        yf = jnp.pad(targets.reshape(B, C, HW), ((0, 0), (0, 0), (0, pad)))
    else:
        xf, yf = logits, targets
    n_rows = (HW + pad) // 128
    x4 = xf.reshape(B, C, n_rows, 128)
    y4 = yf.reshape(B, C, n_rows, 128)

    # ---- VMEM budget -> row-tile size ----
    if vmem_limit_bytes is None:
        try:
            cap = pltpu.get_tpu_info().vmem_capacity_bytes
        except Exception:
            cap = 64 << 20                      # conservative (v7x physical)
        vmem_limit_bytes = min(int(cap * 0.7), 100 << 20)

    ix, iy = x4.dtype.itemsize, y4.dtype.itemsize
    # sublane packing of the narrower input dtype (8 f32 / 16 bf16 / 32 int8)
    sub = 8 * max(1, 4 // max(1, min(ix, iy)))
    if max_rows_override is not None:
        max_rows = max_rows_override
    else:
        # per-grid-step VMEM model: double-buffered inputs + ~7 f32 temporaries
        per_elem = 2 * (ix + iy) + 28
        usable = max(1 << 20, vmem_limit_bytes - (2 << 20))
        max_rows = max(sub, usable // (per_elem * B * 128))

    if n_rows <= max_rows and (n_rows % 8 == 0 or n_rows <= 1024):
        tile_rows = n_rows                      # single full-extent row block
    else:
        tile_rows = max(sub, (min(max_rows, n_rows) // sub) * sub)
    n_tiles = pl.cdiv(n_rows, tile_rows)
    acc_rows = 8 if tile_rows % 8 == 0 else tile_rows

    # ---- optional spatial split (keeps both v7x TCs busy when C is 1/odd) ----
    if force_split is not None:
        n_split = force_split
    else:
        n_split = 2 if (C % 2 == 1 and n_tiles >= 2) else 1
    tps = pl.cdiv(n_tiles, n_split)             # tiles per split
    clamp = (n_split * tps != n_tiles)          # phantom tail tile exists
    needs_mask = (pad != 0) or (n_split * tps * tile_rows != n_rows)

    def in_map(s, c, t):
        idx = s * tps + t
        if clamp:
            idx = jnp.minimum(idx, n_tiles - 1)  # phantom tile -> any valid block
        return (0, c, idx, 0)

    in_spec = pl.BlockSpec((B, 1, tile_rows, 128), in_map)
    out_spec = pl.BlockSpec((1, 1, 3, acc_rows, 128),
                            lambda s, c, t: (c, s, 0, 0, 0))

    kernel = functools.partial(
        _wbce_kernel, hw=HW, tile_rows=tile_rows, tiles_per_split=tps,
        acc_rows=acc_rows, needs_mask=needs_mask)

    total_elems = B * C * HW
    cost = pl.CostEstimate(
        flops=10 * total_elems,
        transcendentals=2 * total_elems,
        bytes_accessed=total_elems * (ix + iy)
        + C * n_split * 3 * acc_rows * 128 * 4)

    partials = pl.pallas_call(
        kernel,
        out_shape=jax.ShapeDtypeStruct((C, n_split, 3, acc_rows, 128),
                                       jnp.float32),
        grid_spec=pltpu.PrefetchScalarGridSpec(
            num_scalar_prefetch=0,
            grid=(n_split, C, tps),
            in_specs=[in_spec, in_spec],
            out_specs=out_spec),
        compiler_params=pltpu.CompilerParams(
            dimension_semantics=("parallel", "parallel", "arbitrary"),
            vmem_limit_bytes=vmem_limit_bytes),
        cost_estimate=cost,
    )(x4, y4)

    # ---- tiny per-class finalize in JAX (beta weighting + mean over class) ----
    sums = jnp.sum(partials, axis=(1, 3, 4))    # (C, 3)
    zero_count, s_zero, s_total = sums[:, 0], sums[:, 1], sums[:, 2]
    beta = zero_count / n_per_class
    s_nonzero = s_total - s_zero
    class_mean = (beta * s_nonzero + (1.0 - beta) * s_zero) / n_per_class
    return {"loss_contour_bce": jnp.sum(class_mean)}


def _reference(logits, targets):
    """Pure-JAX reference mirroring the PyTorch module."""
    if targets.ndim < 4:
        targets = targets[:, None, ...]
    if logits.ndim < 4:
        logits = logits[:, None, ...]
    C = targets.shape[1]
    total = 0.0
    for i in range(C):
        x = logits[:, i, ...].astype(jnp.float32)
        y = targets[:, i, ...].astype(jnp.float32)
        beta = jnp.mean((y == 0.0).astype(jnp.float32))
        mask = jnp.where(y == 0.0, 1.0 - beta, beta)
        loss = jnp.maximum(x, 0.0) - x * y + jnp.log1p(jnp.exp(-jnp.abs(x)))
        total = total + jnp.mean(mask * loss)
    return total


def _check(logits, targets, atol=1e-5, rtol=1e-5, **kw):
    out = weighted_multiclass_bce(logits, targets, **kw)
    got = jax.block_until_ready(out["loss_contour_bce"])
    ref = jax.block_until_ready(_reference(logits, targets))
    assert jnp.allclose(got, ref, rtol=rtol, atol=atol), (got, ref)


if __name__ == "__main__":
    keys = jax.random.split(jax.random.PRNGKey(0), 10)

    # 1) main case: (2, 4, 16, 16) f32, single full-extent tile per class.
    B, C, H, W = 2, 4, 16, 16
    logits = jax.random.normal(keys[0], (B, C, H, W), dtype=jnp.float32)
    targets = (jax.random.uniform(keys[1], (B, C, H, W)) > 0.7).astype(jnp.float32)
    _check(logits, targets)

    # 2) odd C + HW not a multiple of 128 + forced tiling: exercises lane-pad
    #    masking, partial tail tile, dual-TC split and the phantom-tile clamp.
    B, C, H, W = 2, 3, 50, 55
    logits = jax.random.normal(keys[2], (B, C, H, W), dtype=jnp.float32)
    targets = (jax.random.uniform(keys[3], (B, C, H, W)) > 0.6).astype(jnp.float32)
    _check(logits, targets, max_rows_override=8)

    # 3) bf16 logits + forced multi-tile accumulation (sublane packing = 16).
    B, C, H, W = 2, 2, 64, 64
    logits = jax.random.normal(keys[4], (B, C, H, W), dtype=jnp.bfloat16)
    targets = (jax.random.uniform(keys[5], (B, C, H, W)) > 0.5).astype(jnp.float32)
    _check(logits, targets, max_rows_override=16, atol=1e-4, rtol=1e-4)

    # 4) 3-D target (unsqueeze path), C == 1.
    B, H, W = 2, 16, 16
    logits = jax.random.normal(keys[6], (B, 1, H, W), dtype=jnp.float32)
    targets = (jax.random.uniform(keys[7], (B, H, W)) > 0.7).astype(jnp.float32)
    _check(logits, targets)

    # 5) small odd spatial size (HW < 128): lane-pad masking, acc_rows < 8.
    B, C, H, W = 2, 2, 9, 9
    logits = jax.random.normal(keys[8], (B, C, H, W), dtype=jnp.float32)
    targets = (jax.random.uniform(keys[9], (B, C, H, W)) > 0.4).astype(jnp.float32)
    _check(logits, targets)

    print("KERNEL_OK")
</pallas_src>

<mosaic_0001>
module attributes {stable_mosaic.version = 11 : i64} {
  func.func @_wbce_kernel(%arg0: i32, %arg1: i32, %arg2: i32, %arg3: memref<2x1x2x128xf32, #tpu.memory_space<vmem>>, %arg4: memref<2x1x2x128xf32, #tpu.memory_space<vmem>>, %arg5: memref<1x1x3x2x128xf32, #tpu.memory_space<vmem>>) attributes {dimension_semantics = [#tpu.dimension_semantics<parallel>, #tpu.dimension_semantics<parallel>, #tpu.dimension_semantics<arbitrary>], iteration_bounds = array<i64: 1, 4, 1>, scalar_prefetch = 0 : i64, scratch_operands = 0 : i64, tpu.core_type = #tpu.core_type<tc>, window_params = [{transform_indices = @transform_0, window_bounds = array<i64: 2, 1, 2, 128>}, {transform_indices = @transform_1, window_bounds = array<i64: 2, 1, 2, 128>}, {transform_indices = @transform_2, window_bounds = array<i64: 1, 1, 3, 2, 128>}]} {
    %c0_i32 = arith.constant 0 : i32
    %0 = arith.cmpi eq, %arg2, %c0_i32 : i32
    %1 = arith.extui %0 : i1 to i32
    %c0_i32_0 = arith.constant 0 : i32
    %2 = arith.cmpi ne, %1, %c0_i32_0 : i32
    scf.if %2 {
      %cst_23 = arith.constant 0.000000e+00 : f32
      %31 = vector.broadcast %cst_23 : f32 to vector<1x1x3x2x128xf32>
      %c0_24 = arith.constant 0 : index
      %c0_25 = arith.constant 0 : index
      %c0_26 = arith.constant 0 : index
      %c0_27 = arith.constant 0 : index
      %c0_28 = arith.constant 0 : index
      %32 = vector.load %arg5[%c0_24, %c0_25, %c0_26, %c0_27, %c0_28] : memref<1x1x3x2x128xf32, #tpu.memory_space<vmem>>, vector<1x1x3x2x128xf32>
      tpu.vector_store %arg5[%c0_24, %c0_25, %c0_26, %c0_27, %c0_28], %31 {strides = array<i32>} : memref<1x1x3x2x128xf32, #tpu.memory_space<vmem>>, vector<1x1x3x2x128xf32>,
    } else {
    }
    %c0 = arith.constant 0 : index
    %c0_1 = arith.constant 0 : index
    %c0_2 = arith.constant 0 : index
    %c0_3 = arith.constant 0 : index
    %3 = vector.load %arg3[%c0, %c0_1, %c0_2, %c0_3] : memref<2x1x2x128xf32, #tpu.memory_space<vmem>>, vector<2x1x2x128xf32>
    %c0_4 = arith.constant 0 : index
    %c0_5 = arith.constant 0 : index
    %c0_6 = arith.constant 0 : index
    %c0_7 = arith.constant 0 : index
    %4 = vector.load %arg4[%c0_4, %c0_5, %c0_6, %c0_7] : memref<2x1x2x128xf32, #tpu.memory_space<vmem>>, vector<2x1x2x128xf32>
    %cst = arith.constant 0.000000e+00 : f32
    %5 = vector.broadcast %cst : f32 to vector<2x1x2x128xf32>
    %6 = arith.cmpf oeq, %4, %5 : vector<2x1x2x128xf32>
    %7 = arith.extui %6 : vector<2x1x2x128xi1> to vector<2x1x2x128xi32>
    %8 = arith.sitofp %7 : vector<2x1x2x128xi32> to vector<2x1x2x128xf32>
    %cst_8 = arith.constant 0.000000e+00 : f32
    %9 = vector.broadcast %cst_8 : f32 to vector<2x1x2x128xf32>
    %10 = arith.maximumf %3, %9 : vector<2x1x2x128xf32>
    %11 = arith.mulf %3, %4 : vector<2x1x2x128xf32>
    %12 = arith.subf %10, %11 : vector<2x1x2x128xf32>
    %13 = math.absf %3 : vector<2x1x2x128xf32>
    %cst_9 = arith.constant 0.000000e+00 : f32
    %14 = vector.broadcast %cst_9 : f32 to vector<2x1x2x128xf32>
    %15 = arith.subf %14, %13 : vector<2x1x2x128xf32>
    %16 = math.exp %15 : vector<2x1x2x128xf32>
    %17 = math.log1p %16 : vector<2x1x2x128xf32>
    %18 = arith.addf %12, %17 : vector<2x1x2x128xf32>
    %cst_10 = arith.constant dense<0.000000e+00> : vector<2x128xf32>
    %19 = vector.multi_reduction <add>, %8, %cst_10 [0, 1] : vector<2x1x2x128xf32> to vector<2x128xf32>
    %20 = arith.mulf %18, %8 : vector<2x1x2x128xf32>
    %cst_11 = arith.constant dense<0.000000e+00> : vector<2x128xf32>
    %21 = vector.multi_reduction <add>, %20, %cst_11 [0, 1] : vector<2x1x2x128xf32> to vector<2x128xf32>
    %cst_12 = arith.constant dense<0.000000e+00> : vector<2x128xf32>
    %22 = vector.multi_reduction <add>, %18, %cst_12 [0, 1] : vector<2x1x2x128xf32> to vector<2x128xf32>
    %23 = vector.shape_cast %19 : vector<2x128xf32> to vector<1x2x128xf32>
    %24 = vector.shape_cast %21 : vector<2x128xf32> to vector<1x2x128xf32>
    %25 = vector.shape_cast %22 : vector<2x128xf32> to vector<1x2x128xf32>
    %26 = tpu.concatenate %23, %24, %25 in 0 : vector<1x2x128xf32>, vector<1x2x128xf32>, vector<1x2x128xf32> -> vector<3x2x128xf32>
    %27 = vector.shape_cast %26 : vector<3x2x128xf32> to vector<1x1x3x2x128xf32>
    %c0_13 = arith.constant 0 : index
    %c0_14 = arith.constant 0 : index
    %c0_15 = arith.constant 0 : index
    %c0_16 = arith.constant 0 : index
    %c0_17 = arith.constant 0 : index
    %28 = vector.load %arg5[%c0_13, %c0_14, %c0_15, %c0_16, %c0_17] : memref<1x1x3x2x128xf32, #tpu.memory_space<vmem>>, vector<1x1x3x2x128xf32>
    %29 = arith.addf %28, %27 : vector<1x1x3x2x128xf32>
    %c0_18 = arith.constant 0 : index
    %c0_19 = arith.constant 0 : index
    %c0_20 = arith.constant 0 : index
    %c0_21 = arith.constant 0 : index
    %c0_22 = arith.constant 0 : index
    %30 = vector.load %arg5[%c0_18, %c0_19, %c0_20, %c0_21, %c0_22] : memref<1x1x3x2x128xf32, #tpu.memory_space<vmem>>, vector<1x1x3x2x128xf32>
    tpu.vector_store %arg5[%c0_18, %c0_19, %c0_20, %c0_21, %c0_22], %29 {strides = array<i32>} : memref<1x1x3x2x128xf32, #tpu.memory_space<vmem>>, vector<1x1x3x2x128xf32>,
    return
  }
  func.func @transform_0(%arg0: i32, %arg1: i32, %arg2: i32) -> (i32, i32, i32, i32) {
    %c1_i32 = arith.constant 1 : i32
    %0 = arith.muli %arg0, %c1_i32 : i32
    %1 = arith.addi %0, %arg2 : i32
    %c0_i32 = arith.constant 0 : i32
    %c0_i32_0 = arith.constant 0 : i32
    %c0_i32_1 = arith.constant 0 : i32
    return %c0_i32, %arg1, %1, %c0_i32_0 : i32, i32, i32, i32
  }
  func.func @transform_1(%arg0: i32, %arg1: i32, %arg2: i32) -> (i32, i32, i32, i32) {
    %c1_i32 = arith.constant 1 : i32
    %0 = arith.muli %arg0, %c1_i32 : i32
    %1 = arith.addi %0, %arg2 : i32
    %c0_i32 = arith.constant 0 : i32
    %c0_i32_0 = arith.constant 0 : i32
    %c0_i32_1 = arith.constant 0 : i32
    return %c0_i32, %arg1, %1, %c0_i32_0 : i32, i32, i32, i32
  }
  func.func @transform_2(%arg0: i32, %arg1: i32, %arg2: i32) -> (i32, i32, i32, i32, i32) {
    %c0_i32 = arith.constant 0 : i32
    %c0_i32_0 = arith.constant 0 : i32
    %c0_i32_1 = arith.constant 0 : i32
    %c0_i32_2 = arith.constant 0 : i32
    return %arg1, %arg0, %c0_i32, %c0_i32_0, %c0_i32_1 : i32, i32, i32, i32, i32
  }
}

</mosaic_0001>

<bundles_post_ra>
// kernel: tpu_custom_call.1
= control target key start
LH: loop header
LB: loop body
LE: loop exit
PB: predicated region body
PF: predicated region fallthrough
CT: control target
= control target key end

     0   :  { %s869_s0 = inlined_call_operand.hbm [shape: f32[2,4,2,128], index: 0, kind: input, shape index: {}]   ;;  %s870_s1 = inlined_call_operand.hbm [shape: f32[2,4,2,128], index: 1, kind: input, shape index: {}]   ;;  %s871_s2 = inlined_call_operand.hbm [shape: f32[4,1,3,2,128], index: 2, kind: output, shape index: {}]  }
   0x1   :  { %872 = sst [smem:[#allocation11_spill]] %s869_s0 }
   0x2   :  { %7 = vsyncpa [#allocation3], 0 }
   0x3   :  { %9 = vsyncpa [#allocation3 + $0x1], 0 }
   0x4   :  { %10 = vsyncpa [#allocation6], 0 }
   0x5   :  { %12 = vsyncpa [#allocation6 + $0x1], 0 }
   0x6   :  { %13 = vsyncpa [#allocation4], 0 }
   0x7   :  { %15 = vsyncpa [#allocation4 + $0x1], 0  ;;  %s711_s9 = smov 0   ;;  %s713_s10 = smov 0  }
   0x8   :  { %s715_s11 = smov 0   ;;  %s717_s12 = smov 0  }
   0x9   :  { %s719_s13 = smov 0   ;;  %s721_s14 = smov 0  }
   0xa LB: > { %s443_s15 = sadd.s32 4294967295, %s688_s14   ;;  %s444_s16 = sadd.s32 4294967294, %s688_s14   ;;  %s688_s14 = sphi %s721_s14, %s21_s14   ;;  %s684_s13 = sphi %s719_s13, %s883_s13   ;;  %s680_s12 = sphi %s717_s12, %s882_s12   ;;  %s676_s11 = sphi %s715_s11, %s881_s11   ;;  %s672_s10 = sphi %s713_s10, %s880_s10   ;;  %s668_s9 = sphi %s711_s9, %s879_s9  }
   0xb   : > { %s36_s17 = sadd.s32 1, %s684_s13  ;;  %s51_s18 = sadd.s32 1, %s676_s11 }
   0xc   : > { %p38_p0 = scmp.ge.s32.totalorder %s36_s17, 4  ;;  %p58_p1 = scmp.ne.s32.totalorder %s676_s11, %s672_s10 }
   0xd   : > { %p59_p2 = scmp.eq.s32.totalorder %s688_s14, 0  ;;  %p64_p3 = scmp.ne.s32.totalorder %s672_s10, %s668_s9 }
   0xe   : > { %s885_s17 = smov (%p38_p0, %s36_s17), 0  ;;  %p65_p5 = scmp.eq.s32.totalorder %s443_s15, 0 }
   0xf   : > { %p752_p4 = por %p59_p2, %p58_p1  ;;  %s46_s20 = ssub.s32 %s684_s13, %s885_s17 }
  0x10   : > { %p120_p6 = scmp.eq.s32.totalorder %s443_s15, 3  ;;  %p49_p7 = scmp.eq.s32.totalorder %s46_s20, 0 }
  0x11   : > { %p758_p8 = por %p65_p5, %p64_p3  ;;  %p126_p10 = scmp.eq.s32.totalorder %s444_s16, 3 }
  0x12   : > { %p762_p9 = por %p120_p6, %p58_p1  ;;  %p478_p12 = scmp.lt.s32.totalorder %s688_s14, 4 }
  0x13   : > { %s767_s23 = scalar_select %p49_p7, %s676_s11, %s51_s18  }
  0x14   : > { %p769_p11 = por %p126_p10, %p64_p3  ;;  %s775_s25 = sand.u32 1, %s676_s11  }
  0x15   : > { %s447_s26 = sshll.u32 %s775_s25, 2  ;;  %s448_s27 = sshll.u32 %s684_s13, 1 }
  0x16   : > { %s877_s0 = sld [smem:[#allocation11_spill]]  ;;  %s150_s3 = scalar_lea.vmem [#allocation2], %s447_s26 }
  0x17   : > { %s159_s4 = sshll.u32 %s150_s3, 4  ;;  %p784_p13 = pnand %p478_p12, %p752_p4  ;;  %s160_s4 = int_to_ptr.vmem [resolvable:$true] %s159_s4 }
  0x18   : > { %s147_s7 = scalar_lea.sflag [#allocation3], %s775_s25  ;;  %s690_s8 = smov 128  }
  0x19   : > { %s691_s15 = smov 32   ;;  %s692_s16 = smov 2  }
  0x1a   : > { %p451_p0 = scmp.ge.s32.totalorder %s688_s14, 1  ;;  %p190_p1 = scmp.lt.s32.totalorder %s688_s14, 5 }
  0x1b   : > { %s179_s19 = scalar_lea.hbm %s870_s1, %s448_s27  ;;  %s173_s29 = scalar_lea.vmem [#allocation5], %s447_s26 }
  0x1c   : > { %s156_s30 = scalar_lea.hbm %s877_s0, %s448_s27  ;;  %p191_p2 = pnand %p451_p0, %p190_p1 }
  0x1d   : > { %s157_s5 = sshll.u32 %s156_s30, 4  ;;  %s180_s28 = sshll.u32 %s179_s19, 4  ;;  %s158_s5 = int_to_ptr.hbm [resolvable:$true] %s157_s5  ;;  %s181_s28 = int_to_ptr.hbm [resolvable:$true] %s180_s28 }
  0x1e   : > { %470 = dma.hbm_to_vmem [thread:$0]  (!%p784_p13), %s158_s5, 64, %s160_s4, %s147_s7, %s690_s8, %s691_s15, %s692_s16  }
  0x1f   : > { %s182_s30 = sshll.u32 %s173_s29, 4  ;;  %s170_s3 = scalar_lea.sflag [#allocation6], %s775_s25  ;;  %s183_s30 = int_to_ptr.vmem [resolvable:$true] %s182_s30 }
  0x20   : > { %473 = dma.hbm_to_vmem [thread:$0]  (!%p784_p13), %s181_s28, 64, %s183_s30, %s170_s3, %s690_s8, %s691_s15, %s692_s16  }
  0x21   : > { %194 = sbr.rel (%p191_p2) target bundleno = 82 (0x52), region = 28  ;;  %s800_s0 = sand.u32 (!%p191_p2), 1, %s672_s10  }
  0x22   : > { %s452_s4 = sshll.u32 (!%p191_p2), %s800_s0, 2  ;;  %s197_s5 = scalar_lea.sflag (!%p191_p2), [#allocation3], %s800_s0 }
  0x23   : > { %s200_s7 = scalar_lea.vmem (!%p191_p2), [#allocation2], %s452_s4 }
  0x26   : > { %655 = dma.done.wait (%p758_p8), %s197_s5, 64  }
  0x27   : > { %657 = vsyncadd (%p758_p8), %s197_s5, 4294967232  ;;  %s207_s25 = scalar_lea.sflag [#allocation6], %s800_s0  ;;  %s210_s26 = scalar_lea.vmem [#allocation5], %s452_s4 }
  0x28   : > { %659 = dma.done.wait (%p758_p8), %s207_s25, 64  }
  0x29   : > { %661 = vsyncadd (%p758_p8), %s207_s25, 4294967232  ;;  %s459_s27 = smul.u32 6, %s800_s0  ;;  %v693_v0 = vmov 0.0   ;;  %vm290_vm0 = vcmask 1041408   ;;  %v246_v1 = vld [vmem:[%s200_s7] sm:$0x3] }
  0x2a   : > { %v247_v2 = vld [vmem:[%s200_s7 + $0x2] sm:$0x3]  ;;  %v248_v3 = vld [vmem:[%s210_s26] sm:$0x3]  ;;  %v249_v4 = vld [vmem:[%s210_s26 + $0x2] sm:$0x3] }
  0x2b   : > { %s814_s6 = scalar_lea.vmem [#allocation7], %s459_s27  ;;  %vm250_vm1 = vcmp.eq.f32.partialorder %v248_v3, 0.0  ;;  %v262_v5 = vand.u32 2147483647, %v246_v1  ;;  %vm251_vm2 = vcmp.eq.f32.partialorder %v249_v4, 0.0  ;;  %v258_v25 = vmul.f32 %v248_v3, %v246_v1  ;;  %s460_s21 = smul.u32 6, %s680_s12 }
  0x2c   : > { %243 = vst [vmem:[%s814_s6] sm:$0x3] %v693_v0  ;;  %v454_v6 = vsel %vm250_vm1, 1.0, %v693_v0  ;;  %v263_v7 = vand.u32 2147483647, %v247_v2  ;;  %v455_v8 = vsel %vm251_vm2, 1.0, %v693_v0  ;;  %v256_v26 = vmax.f32 %v246_v1, 0.0 }
  0x2d   : > { %244 = vst [vmem:[%s814_s6 + $0x2] sm:$0x3] %v693_v0  ;;  %v264_v9 = vsub.f32 0.0, %v262_v5  ;;  %v291_v10 = vsel %vm290_vm0, %v454_v6, 0.0  ;;  %v292_v12 = vsel %vm290_vm0, %v455_v8, 0.0  ;;  %v259_v29 = vmul.f32 %v249_v4, %v247_v2  ;;  %s325_s16 = scalar_lea.hbm %s871_s2, %s460_s21  ;;  %s326_s12 = sshll.u32 %s814_s6, 4  ;;  %s327_s12 = int_to_ptr.vmem [resolvable:$true] %s326_s12 }
  0x2e   : > { %245 = vst [vmem:[%s814_s6 + $0x4] sm:$0x3] %v693_v0  ;;  %v265_v11 = vsub.f32 0.0, %v263_v7  ;;  %v293_v15 = vadd.f32 %v292_v12, %v291_v10  ;;  %v257_v30 = vmax.f32 %v247_v2, 0.0  ;;  %v260_v34 = vsub.f32 %v256_v26, %v258_v25  ;;  %s328_s18 = sshll.u32 %s325_s16, 4  ;;  %s312_s20 = scalar_lea.sflag [#allocation4], %s800_s0  ;;  %s329_s18 = int_to_ptr.hbm [resolvable:$true] %s328_s18 }
  0x2f   : > { %v266_v14 = vmul.f32 1.442695, %v264_v9  ;;  %s616_s19 = sshra.s32 %s329_s18, 4  ;;  %s622_s3 = scalar_lea.hbm %s871_s2, 24  ;;  %s617_s19 = int_to_ptr.hbm [resolvable:$true] %s616_s19 }
  0x30   : > { %v268_v16 = vmul.f32 1.442695, %v265_v11  ;;  %v261_v37 = vsub.f32 %v257_v30, %v259_v29  ;;  %s618_s28 = scalar_lea.hbm %s617_s19, 6  ;;  %p623_p6 = scmp.lt.s32.totalorder %s617_s19, %s871_s2 }
  0x31   : > { %534 = vpow2.f32 %v266_v14  ;;  %p619_p3 = scmp.ne.s32.totalorder %s617_s19, %s618_s28  ;;  %p624_p7 = scmp.lt.s32.totalorder %s622_s3, %s618_s28 }
  0x32   : > { %536 = vpow2.f32 %v268_v16 }
  0x33   : > { %v302_v13 = vld [vmem:[%s814_s6] sm:$0x3]  ;;  %p620_p4 = pnand %p619_p3, %p762_p9  ;;  %p625_p8 = por %p624_p7, %p623_p6 }
  0x34   : > { %v305_v17 = vadd.f32 %v302_v13, %v293_v15  ;;  %v303_v52 = vld [vmem:[%s814_s6 + $0x2] sm:$0x3] }
  0x35   : > { %v304_v48 = vld [vmem:[%s814_s6 + $0x4] sm:$0x3]  ;;  %p621_p5 = pneg %p620_p4 }
  0x36   : > { %308 = vst [vmem:[%s814_s6] sm:$0x3] %v305_v17 }
  0x37   : > { %v535_v18 = vpop.eup %534  ;;  %p626_p10 = pnand %p625_p8, %p621_p5 }
  0x38   : > { %v537_v19 = vpop.eup %536  ;;  %v270_v20 = vadd.f32 1.0, %v535_v18  ;;  %v273_v21 = vmul.f32 -0.5, %v535_v18  ;;  %v276_v27 = vand.u32 2147483647, %v535_v18 }
  0x39   : > { %v279_v22 = vadd.f32 1.0, %v537_v19  ;;  %v282_v23 = vmul.f32 -0.5, %v537_v19  ;;  %v285_v31 = vand.u32 2147483647, %v537_v19 }
  0x3a   : > { %538 = vlog2.f32 %v270_v20  ;;  %v274_v24 = vadd.f32 1.0, %v273_v21  ;;  %vm277_vm3 = vcmp.lt.f32.partialorder %v276_v27, 0.0004427343 }
  0x3b   : > { %540 = vlog2.f32 %v279_v22  ;;  %v283_v28 = vadd.f32 1.0, %v282_v23  ;;  %vm286_vm4 = vcmp.lt.f32.partialorder %v285_v31, 0.0004427343 }
  0x3c   : > { %v275_v32 = vmul.f32 %v535_v18, %v274_v24 }
  0x3d   : > { %v284_v35 = vmul.f32 %v537_v19, %v283_v28 }
  0x40   : > { %v539_v33 = vpop.eup %538 }
  0x41   : > { %v541_v36 = vpop.eup %540  ;;  %v272_v38 = vmul.f32 0.6931472, %v539_v33 }
  0x42   : > { %v281_v39 = vmul.f32 0.6931472, %v541_v36 }
  0x43   : > { %v278_v40 = vsel %vm277_vm3, %v275_v32, %v272_v38 }
  0x44   : > { %v287_v41 = vsel %vm286_vm4, %v284_v35, %v281_v39  ;;  %v288_v42 = vadd.f32 %v278_v40, %v260_v34 }
  0x45   : > { %v289_v43 = vadd.f32 %v287_v41, %v261_v37 }
  0x46   : > { %v294_v44 = vmul.f32 %v454_v6, %v288_v42  ;;  %v299_v45 = vsel %vm290_vm0, %v288_v42, 0.0 }
  0x47   : > { %v295_v46 = vmul.f32 %v455_v8, %v289_v43  ;;  %v300_v47 = vsel %vm290_vm0, %v289_v43, 0.0 }
  0x48   : > { %v296_v49 = vsel %vm290_vm0, %v294_v44, 0.0  ;;  %v301_v50 = vadd.f32 %v300_v47, %v299_v45 }
  0x49   : > { %v297_v51 = vsel %vm290_vm0, %v295_v46, 0.0 }
  0x4a   : > { %v298_v53 = vadd.f32 %v297_v51, %v296_v49  ;;  %v307_v54 = vadd.f32 %v304_v48, %v301_v50 }
  0x4c   : > { %v306_v55 = vadd.f32 %v303_v52, %v298_v53  ;;  %310 = vst [vmem:[%s814_s6 + $0x4] sm:$0x3] %v307_v54 }
  0x4e   : > { %309 = vst [vmem:[%s814_s6 + $0x2] sm:$0x3] %v306_v55 }
  0x4f   : > { %629 = shalt.err (!%p626_p10)
}
  0x50   : > { %s694_s0 = smov 32   ;;  %s695_s7 = smov 2  }
  0x51   : > { %465 = dma.vmem_to_hbm [thread:$0]  (%p762_p9), %s327_s12, 96, %s329_s18, %s312_s20, %s694_s0, %s694_s0, %s695_s7  }
  0x52 PF: > { %p479_p12 = scmp.ge.s32.totalorder %s688_s14, 2  ;;  %s343_s25 = sand.u32 1, %s668_s9  }
  0x53   : > { %s344_s26 = scalar_lea.sflag [#allocation4], %s343_s25 }
  0x54   : > { %p475_p13 = pnand %p479_p12, %p769_p11 }
  0x56   : > { %p476_p0 = pneg %p475_p13 }
  0x58   : > { %663 = dma.done.wait (%p476_p0), %s344_s26, 96  }
  0x59   : > { %665 = vsyncadd (%p476_p0), %s344_s26, 4294967200  ;;  %s21_s14 = sadd.s32 1, %s688_s14   ;;  %s879_s9 = smov %s672_s10 }
  0x5a   : > { %p18_p1 = scmp.ge.s32.totalorder %s21_s14, 6   ;;  %s880_s10 = smov %s676_s11 }
  0x5b   : > { %s881_s11 = smov %s767_s23  ;;  %s882_s12 = smov %s684_s13 }
  0x5c   : > { %s883_s13 = smov %s885_s17  ;;  %20 = sbr.rel (!%p18_p1) target bundleno = 10 (0xa), region = 90 }
  0x61   :  { %350 = vsyncpa [#allocation3], 1 }
  0x62   :  { %352 = vsyncpa [#allocation3 + $0x1], 1 }
  0x63   :  { %353 = vsyncpa [#allocation6], 1 }
  0x64   :  { %355 = vsyncpa [#allocation6 + $0x1], 1 }
  0x65   :  { %356 = vsyncpa [#allocation4], 1 }
  0x66   :  { %358 = vsyncpa [#allocation4 + $0x1], 1 }

</bundles_post_ra>
